<compile_context>
chip_gen: v7x
topology: tpu7x:2x2x1
jax: 0.10.0
libtpu: 0.0.40
codegen_flags: <defaults>
</compile_context>

<pallas_src>
import jax
import jax.numpy as jnp
from jax.experimental import pallas as pl
from jax.experimental.pallas import tpu as pltpu

LANE = 128
ROW_MULT = 16            # sublane-safe row multiple for both f32 (8) and bf16 (16) tiles
NEG_INF = -1e30          # finite "minus infinity" for padded class lanes (avoids inf-inf)


def _round_up(n: int, m: int) -> int:
    return (n + m - 1) // m * m


def mlp_ucl_kernel(x_ref, w1_ref, b1_ref, w2_ref, b2_ref, w3_ref, b3_ref, out_ref):
    # x arrives in f32 straight from HBM; cast to the matmul operand dtype on the VPU
    # (free in this mem-bound regime) instead of materializing a bf16 copy in HBM.
    x = x_ref[...].astype(w1_ref.dtype)

    # fc1 + relu  (MXU in operand dtype, f32 accumulation; bias/activation math in f32)
    h = jnp.dot(x, w1_ref[...], preferred_element_type=jnp.float32)
    h = jnp.maximum(h + b1_ref[...], 0.0)

    # fc2 + relu
    h = jnp.dot(h.astype(w2_ref.dtype), w2_ref[...], preferred_element_type=jnp.float32)
    h = jnp.maximum(h + b2_ref[...], 0.0)

    # last (classifier) + log_softmax over the (padded) class lanes.
    # Padded class columns have zero weights and bias = -1e30 -> exp underflows to 0,
    # so they do not perturb the real-class log_softmax.
    y = jnp.dot(h.astype(w3_ref.dtype), w3_ref[...], preferred_element_type=jnp.float32)
    y = y + b3_ref[...]
    m = jnp.max(y, axis=1, keepdims=True)
    z = y - m
    lse = jnp.log(jnp.sum(jnp.exp(z), axis=1, keepdims=True))
    # Output cast happens strictly AFTER (z - lse); all softmax math stays f32.
    out_ref[...] = (z - lse).astype(out_ref.dtype)


def prepare_params(params, *, use_bf16: bool = True):
    """Pad/cast the (tiny) weights once; reuse across forward calls (hoisted per review)."""
    w1, b1 = params["w1"], params["b1"]
    w2, b2 = params["w2"], params["b2"]
    w3, b3 = params["w3"], params["b3"]
    in_dim, units = w1.shape
    n_classes = w3.shape[1]

    in_pad = _round_up(in_dim, LANE)
    h_pad = _round_up(units, LANE)    # keep 128: HBM-bound, do not widen to 256
    c_pad = _round_up(n_classes, LANE)
    mm_dtype = jnp.bfloat16 if use_bf16 else jnp.float32

    def pad2(a, rows, cols, fill=0.0):
        a = a.astype(jnp.float32)
        return jnp.pad(a, ((0, rows - a.shape[0]), (0, cols - a.shape[1])),
                       constant_values=fill)

    padded = dict(
        w1=pad2(w1, in_pad, h_pad).astype(mm_dtype),
        w2=pad2(w2, h_pad, h_pad).astype(mm_dtype),
        w3=pad2(w3, h_pad, c_pad).astype(mm_dtype),
        b1=pad2(b1, 1, h_pad),                       # f32
        b2=pad2(b2, 1, h_pad),                       # f32
        b3=pad2(b3, 1, c_pad, fill=NEG_INF),         # f32, padded classes -> -1e30
    )
    meta = dict(in_dim=in_dim, in_pad=in_pad, h_pad=h_pad, c_pad=c_pad,
                n_classes=n_classes, use_bf16=use_bf16)
    return padded, meta


def mlp_ucl_forward(x_nchw, padded, meta, *, tm_max: int = 4096, return_padded: bool = False):
    """x_nchw: (B, C, H, W) float32. padded/meta: from prepare_params()."""
    B = x_nchw.shape[0]
    in_dim, in_pad = meta["in_dim"], meta["in_pad"]
    h_pad, c_pad = meta["h_pad"], meta["c_pad"]
    n_classes = meta["n_classes"]
    mm_dtype = jnp.bfloat16 if meta["use_bf16"] else jnp.float32
    out_dtype = jnp.bfloat16 if meta["use_bf16"] else jnp.float32

    x_flat = x_nchw.reshape(B, -1)   # same flatten order as torch .view(B, -1)

    # --- batch tiling: weights resident, activations streamed tile-by-tile ----------
    pB_min = _round_up(B, ROW_MULT)
    TM = min(tm_max, pB_min)
    # Keep >= 2 grid steps whenever the batch spans >= 2 minimal tiles, so v7x's
    # second TensorCore (via the "parallel" axis) is never left idle on a 1-tile grid.
    if TM == pB_min and pB_min >= 2 * ROW_MULT:
        TM = _round_up((pB_min + 1) // 2, ROW_MULT)
    pB = _round_up(B, TM)
    grid = (pB // TM,)

    # x stays f32 (no wrapper-side dtype cast); only zero-pad to the tile grid.
    x_p = jnp.pad(x_flat.astype(jnp.float32),
                  ((0, pB - B), (0, in_pad - in_dim)))

    const = lambda i: (0, 0)          # weights/biases: same block every step (VMEM-resident)
    row = lambda i: (i, 0)            # activations/output: stream over batch tiles

    w_bytes = jnp.dtype(mm_dtype).itemsize
    out_bytes = jnp.dtype(out_dtype).itemsize
    cost = pl.CostEstimate(
        flops=2 * pB * (in_pad * h_pad + h_pad * h_pad + h_pad * c_pad),
        transcendentals=pB * (c_pad + 1),
        bytes_accessed=(pB * in_pad * 4                                   # x stream (f32)
                        + pB * c_pad * out_bytes                          # output
                        + (in_pad * h_pad + h_pad * h_pad + h_pad * c_pad) * w_bytes
                        + (2 * h_pad + c_pad) * 4),                       # biases
    )

    out_p = pl.pallas_call(
        mlp_ucl_kernel,
        out_shape=jax.ShapeDtypeStruct((pB, c_pad), out_dtype),
        grid=grid,
        in_specs=[
            pl.BlockSpec((TM, in_pad), row),        # x tile (f32, cast in-kernel)
            pl.BlockSpec((in_pad, h_pad), const),   # w1
            pl.BlockSpec((1, h_pad), const),        # b1
            pl.BlockSpec((h_pad, h_pad), const),    # w2
            pl.BlockSpec((1, h_pad), const),        # b2
            pl.BlockSpec((h_pad, c_pad), const),    # w3
            pl.BlockSpec((1, c_pad), const),        # b3
        ],
        out_specs=pl.BlockSpec((TM, c_pad), row),
        compiler_params=pltpu.CompilerParams(
            dimension_semantics=("parallel",),      # batch tiles independent (megacore)
            vmem_limit_bytes=48 * 1024 * 1024,      # safe on v5e/v6e/v7x; ample for TM=4096
        ),
        cost_estimate=cost,
    )(x_p, padded["w1"], padded["b1"], padded["w2"], padded["b2"],
      padded["w3"], padded["b3"])

    if return_padded:
        return out_p                 # (pB, c_pad); real logits live in [:B, :n_classes]
    return out_p[:B, :n_classes]


def init_params(key, in_dim, units, n_classes):
    """Deterministic synthetic init (mean weights of the BayesianLinear layers)."""
    ks = jax.random.split(key, 6)

    def lin(kw, kb, fan_in, fan_out):
        w = jax.random.normal(kw, (fan_in, fan_out), jnp.float32) * (1.0 / jnp.sqrt(fan_in))
        b = jax.random.normal(kb, (1, fan_out), jnp.float32) * 0.01
        return w, b

    w1, b1 = lin(ks[0], ks[1], in_dim, units)
    w2, b2 = lin(ks[2], ks[3], units, units)
    w3, b3 = lin(ks[4], ks[5], units, n_classes)
    return {"w1": w1, "b1": b1, "w2": w2, "b2": b2, "w3": w3, "b3": b3}


def reference_forward(x_nchw, params):
    B = x_nchw.shape[0]
    h = x_nchw.reshape(B, -1)
    h = jnp.maximum(h @ params["w1"] + params["b1"], 0.0)
    h = jnp.maximum(h @ params["w2"] + params["b2"], 0.0)
    y = h @ params["w3"] + params["b3"]
    return jax.nn.log_softmax(y, axis=1)


if __name__ == "__main__":
    # Small shapes consistent with the module: input_size=(1, 16, 16), units=32,
    # taskcla=[(0, 10)], split=False, notMNIST=False.
    B, C, H, W = 8, 1, 16, 16
    UNITS, N_CLASSES = 32, 10

    key = jax.random.PRNGKey(0)
    kx, kp = jax.random.split(key)
    x = jax.random.normal(kx, (B, C, H, W), jnp.float32)
    params = init_params(kp, C * H * W, UNITS, N_CLASSES)

    ref = reference_forward(x, params)

    # Exact-semantics path (f32 operands + f32 output): matches the reference tightly.
    pf32, mf32 = prepare_params(params, use_bf16=False)
    out_f32 = mlp_ucl_forward(x, pf32, mf32)
    jax.block_until_ready(out_f32)
    assert out_f32.shape == (B, N_CLASSES)
    assert jnp.allclose(out_f32, ref, atol=1e-5, rtol=1e-5)

    # Performance path (bf16 matmul operands + bf16 output, f32 accumulation/softmax).
    pbf16, mbf16 = prepare_params(params, use_bf16=True)
    out_bf16 = mlp_ucl_forward(x, pbf16, mbf16)
    jax.block_until_ready(out_bf16)
    assert out_bf16.shape == (B, N_CLASSES)
    assert jnp.allclose(out_bf16.astype(jnp.float32), ref, atol=1e-1, rtol=1e-1)

    # TODO(synk): split=True (per-task heads), notMNIST=True (fc3/fc4) branch, and the
    # sample=True Bayesian-sampling path are not instantiated here; only the default
    # non-split, 2-hidden-layer mean-weight forward is implemented.
    print("KERNEL_OK")
</pallas_src>

<mosaic_0001>
module attributes {stable_mosaic.version = 11 : i64} {
  func.func @mlp_ucl_kernel(%arg0: i32, %arg1: memref<16x256xf32, #tpu.memory_space<vmem>>, %arg2: memref<256x128xf32, #tpu.memory_space<vmem>>, %arg3: memref<1x128xf32, #tpu.memory_space<vmem>>, %arg4: memref<128x128xf32, #tpu.memory_space<vmem>>, %arg5: memref<1x128xf32, #tpu.memory_space<vmem>>, %arg6: memref<128x128xf32, #tpu.memory_space<vmem>>, %arg7: memref<1x128xf32, #tpu.memory_space<vmem>>, %arg8: memref<16x128xf32, #tpu.memory_space<vmem>>) attributes {dimension_semantics = [#tpu.dimension_semantics<parallel>], iteration_bounds = array<i64: 1>, scalar_prefetch = 0 : i64, scratch_operands = 0 : i64, tpu.core_type = #tpu.core_type<tc>, window_params = [{transform_indices = @transform_0, window_bounds = array<i64: 16, 256>}, {pipeline_mode = #tpu.pipeline_mode<synchronous>, transform_indices = @transform_1, window_bounds = array<i64: 256, 128>}, {pipeline_mode = #tpu.pipeline_mode<synchronous>, transform_indices = @transform_2, window_bounds = array<i64: 1, 128>}, {pipeline_mode = #tpu.pipeline_mode<synchronous>, transform_indices = @transform_3, window_bounds = array<i64: 128, 128>}, {pipeline_mode = #tpu.pipeline_mode<synchronous>, transform_indices = @transform_4, window_bounds = array<i64: 1, 128>}, {pipeline_mode = #tpu.pipeline_mode<synchronous>, transform_indices = @transform_5, window_bounds = array<i64: 128, 128>}, {pipeline_mode = #tpu.pipeline_mode<synchronous>, transform_indices = @transform_6, window_bounds = array<i64: 1, 128>}, {transform_indices = @transform_7, window_bounds = array<i64: 16, 128>}]} {
    %c0 = arith.constant 0 : index
    %c0_0 = arith.constant 0 : index
    %0 = vector.load %arg1[%c0, %c0_0] : memref<16x256xf32, #tpu.memory_space<vmem>>, vector<16x256xf32>
    %c0_1 = arith.constant 0 : index
    %c0_2 = arith.constant 0 : index
    %1 = vector.load %arg2[%c0_1, %c0_2] : memref<256x128xf32, #tpu.memory_space<vmem>>, vector<256x128xf32>
    %cst = arith.constant dense<0.000000e+00> : vector<16x128xf32>
    %2 = tpu.matmul %0, %1, %cst {dimension_numbers = #tpu.dot_dimension_numbers<[1], [0], [0], [1], [0, 0, 1, 1], [], []>} : vector<16x256xf32>, vector<256x128xf32>, vector<16x128xf32> -> vector<16x128xf32>
    %c0_3 = arith.constant 0 : index
    %c0_4 = arith.constant 0 : index
    %3 = vector.load %arg3[%c0_3, %c0_4] : memref<1x128xf32, #tpu.memory_space<vmem>>, vector<1x128xf32>
    %4 = vector.broadcast %3 : vector<1x128xf32> to vector<16x128xf32>
    %5 = arith.addf %2, %4 : vector<16x128xf32>
    %cst_5 = arith.constant 0.000000e+00 : f32
    %6 = vector.broadcast %cst_5 : f32 to vector<16x128xf32>
    %7 = arith.maximumf %5, %6 : vector<16x128xf32>
    %c0_6 = arith.constant 0 : index
    %c0_7 = arith.constant 0 : index
    %8 = vector.load %arg4[%c0_6, %c0_7] : memref<128x128xf32, #tpu.memory_space<vmem>>, vector<128x128xf32>
    %cst_8 = arith.constant dense<0.000000e+00> : vector<16x128xf32>
    %9 = tpu.matmul %7, %8, %cst_8 {dimension_numbers = #tpu.dot_dimension_numbers<[1], [0], [0], [1], [0, 0, 1, 1], [], []>} : vector<16x128xf32>, vector<128x128xf32>, vector<16x128xf32> -> vector<16x128xf32>
    %c0_9 = arith.constant 0 : index
    %c0_10 = arith.constant 0 : index
    %10 = vector.load %arg5[%c0_9, %c0_10] : memref<1x128xf32, #tpu.memory_space<vmem>>, vector<1x128xf32>
    %11 = vector.broadcast %10 : vector<1x128xf32> to vector<16x128xf32>
    %12 = arith.addf %9, %11 : vector<16x128xf32>
    %cst_11 = arith.constant 0.000000e+00 : f32
    %13 = vector.broadcast %cst_11 : f32 to vector<16x128xf32>
    %14 = arith.maximumf %12, %13 : vector<16x128xf32>
    %c0_12 = arith.constant 0 : index
    %c0_13 = arith.constant 0 : index
    %15 = vector.load %arg6[%c0_12, %c0_13] : memref<128x128xf32, #tpu.memory_space<vmem>>, vector<128x128xf32>
    %cst_14 = arith.constant dense<0.000000e+00> : vector<16x128xf32>
    %16 = tpu.matmul %14, %15, %cst_14 {dimension_numbers = #tpu.dot_dimension_numbers<[1], [0], [0], [1], [0, 0, 1, 1], [], []>} : vector<16x128xf32>, vector<128x128xf32>, vector<16x128xf32> -> vector<16x128xf32>
    %c0_15 = arith.constant 0 : index
    %c0_16 = arith.constant 0 : index
    %17 = vector.load %arg7[%c0_15, %c0_16] : memref<1x128xf32, #tpu.memory_space<vmem>>, vector<1x128xf32>
    %18 = vector.broadcast %17 : vector<1x128xf32> to vector<16x128xf32>
    %19 = arith.addf %16, %18 : vector<16x128xf32>
    %cst_17 = arith.constant dense<0xFF800000> : vector<16xf32>
    %20 = vector.multi_reduction <maximumf>, %19, %cst_17 [1] : vector<16x128xf32> to vector<16xf32>
    %21 = vector.shape_cast %20 : vector<16xf32> to vector<16x1xf32>
    %22 = vector.broadcast %21 : vector<16x1xf32> to vector<16x128xf32>
    %23 = arith.subf %19, %22 : vector<16x128xf32>
    %24 = math.exp %23 : vector<16x128xf32>
    %cst_18 = arith.constant dense<0.000000e+00> : vector<16xf32>
    %25 = vector.multi_reduction <add>, %24, %cst_18 [1] : vector<16x128xf32> to vector<16xf32>
    %26 = vector.shape_cast %25 : vector<16xf32> to vector<16x1xf32>
    %27 = math.log %26 : vector<16x1xf32>
    %28 = vector.broadcast %27 : vector<16x1xf32> to vector<16x128xf32>
    %29 = arith.subf %23, %28 : vector<16x128xf32>
    %c0_19 = arith.constant 0 : index
    %c0_20 = arith.constant 0 : index
    %30 = vector.load %arg8[%c0_19, %c0_20] : memref<16x128xf32, #tpu.memory_space<vmem>>, vector<16x128xf32>
    tpu.vector_store %arg8[%c0_19, %c0_20], %29 {strides = array<i32>} : memref<16x128xf32, #tpu.memory_space<vmem>>, vector<16x128xf32>,
    return
  }
  func.func @transform_0(%arg0: i32) -> (i32, i32) {
    %c0_i32 = arith.constant 0 : i32
    %c0_i32_0 = arith.constant 0 : i32
    return %arg0, %c0_i32 : i32, i32
  }
  func.func @transform_1(%arg0: i32) -> (i32, i32) {
    %c0_i32 = arith.constant 0 : i32
    %c0_i32_0 = arith.constant 0 : i32
    %c0_i32_1 = arith.constant 0 : i32
    return %c0_i32, %c0_i32_0 : i32, i32
  }
  func.func @transform_2(%arg0: i32) -> (i32, i32) {
    %c0_i32 = arith.constant 0 : i32
    %c0_i32_0 = arith.constant 0 : i32
    %c0_i32_1 = arith.constant 0 : i32
    return %c0_i32, %c0_i32_0 : i32, i32
  }
  func.func @transform_3(%arg0: i32) -> (i32, i32) {
    %c0_i32 = arith.constant 0 : i32
    %c0_i32_0 = arith.constant 0 : i32
    %c0_i32_1 = arith.constant 0 : i32
    return %c0_i32, %c0_i32_0 : i32, i32
  }
  func.func @transform_4(%arg0: i32) -> (i32, i32) {
    %c0_i32 = arith.constant 0 : i32
    %c0_i32_0 = arith.constant 0 : i32
    %c0_i32_1 = arith.constant 0 : i32
    return %c0_i32, %c0_i32_0 : i32, i32
  }
  func.func @transform_5(%arg0: i32) -> (i32, i32) {
    %c0_i32 = arith.constant 0 : i32
    %c0_i32_0 = arith.constant 0 : i32
    %c0_i32_1 = arith.constant 0 : i32
    return %c0_i32, %c0_i32_0 : i32, i32
  }
  func.func @transform_6(%arg0: i32) -> (i32, i32) {
    %c0_i32 = arith.constant 0 : i32
    %c0_i32_0 = arith.constant 0 : i32
    %c0_i32_1 = arith.constant 0 : i32
    return %c0_i32, %c0_i32_0 : i32, i32
  }
  func.func @transform_7(%arg0: i32) -> (i32, i32) {
    %c0_i32 = arith.constant 0 : i32
    %c0_i32_0 = arith.constant 0 : i32
    return %arg0, %c0_i32 : i32, i32
  }
}

</mosaic_0001>

<bundles_post_ra>
// kernel: tpu_custom_call.1
= control target key start
LH: loop header
LB: loop body
LE: loop exit
PB: predicated region body
PF: predicated region fallthrough
CT: control target
= control target key end

     0   :  { %12 = vsyncpa [#allocation3], 0  ;;  %s956_s0 = inlined_call_operand.hbm [shape: f32[16,256], index: 0, kind: input, shape index: {}]   ;;  %s957_s1 = inlined_call_operand.hbm [shape: f32[256,128], index: 1, kind: input, shape index: {}]   ;;  %s958_s2 = inlined_call_operand.vmem [shape: f32[1,128], index: 2, kind: input, shape index: {}]   ;;  %s959_s3 = inlined_call_operand.hbm [shape: f32[128,128], index: 3, kind: input, shape index: {}]   ;;  %s960_s4 = inlined_call_operand.vmem [shape: f32[1,128], index: 4, kind: input, shape index: {}]   ;;  %s961_s5 = inlined_call_operand.hbm [shape: f32[128,128], index: 5, kind: input, shape index: {}]   ;;  %s962_s6 = inlined_call_operand.vmem [shape: f32[1,128], index: 6, kind: input, shape index: {}]   ;;  %s963_s7 = inlined_call_operand.hbm [shape: f32[16,128], index: 7, kind: output, shape index: {}]  }
   0x1   :  { %13 = vsyncpa [#allocation6], 0 }
   0x2   :  { %14 = vsyncpa [#allocation9], 0 }
   0x3   :  { %15 = vsyncpa [#allocation4], 0  ;;  %s819_s24 = smov [#allocation5]   ;;  %s701_s28 = scalar_lea.hbm %s957_s1, 4096 }
   0x4   :  { %s33_s25 = sshll.u32 %s819_s24, 4  ;;  %p702_p0 = scmp.ne.s32.totalorder %s957_s1, %s701_s28  ;;  %s34_s25 = int_to_ptr.vmem [resolvable:$true] %s33_s25 }
   0x5   :  { %p705_p1 = scmp.lt.u32.totalorder %s701_s28, %s957_s1 }
   0x7   :  { %p707_p2 = pnand %p705_p1, %p702_p0 }
   0x9   :  { %710 = shalt.err (!%p707_p2)
}
   0xa   :  { %s711_s10 = scalar_lea.vmem %s34_s25, 4096  ;;  %p716_p4 = scmp.lt.s32.totalorder %s34_s25, %s34_s25 }
   0xb   :  { %p712_p3 = scmp.ne.s32.totalorder %s34_s25, %s711_s10  ;;  %p717_p5 = scmp.lt.s32.totalorder %s711_s10, %s711_s10 }
   0xd   :  { %p718_p6 = por %p717_p5, %p716_p4 }
   0xf   :  { %p719_p7 = pnand %p718_p6, %p712_p3 }
  0x11   :  { %722 = shalt.err (!%p719_p7)
}
  0x12   :  { %s820_s11 = smov 128   ;;  %s821_s12 = smov 8  }
  0x13   :  { %39 = dma.hbm_to_vmem [thread:$0]  %s957_s1, 4096, %s34_s25, [#allocation6], %s820_s11, %s820_s11, %s821_s12  }
  0x14   :  { %s822_s15 = smov [#allocation2]   ;;  %s723_s19 = scalar_lea.hbm %s956_s0, 512 }
  0x15   :  { %s21_s16 = sshll.u32 %s822_s15, 4  ;;  %p724_p8 = scmp.ne.s32.totalorder %s956_s0, %s723_s19  ;;  %s22_s16 = int_to_ptr.vmem [resolvable:$true] %s21_s16 }
  0x16   :  { %p727_p9 = scmp.lt.u32.totalorder %s723_s19, %s956_s0 }
  0x18   :  { %p729_p10 = pnand %p727_p9, %p724_p8 }
  0x1a   :  { %732 = shalt.err (!%p729_p10)
}
  0x1b   :  { %s733_s24 = scalar_lea.vmem %s22_s16, 512  ;;  %p738_p12 = scmp.lt.s32.totalorder %s22_s16, %s22_s16 }
  0x1c   :  { %p734_p11 = scmp.ne.s32.totalorder %s22_s16, %s733_s24  ;;  %p739_p13 = scmp.lt.s32.totalorder %s733_s24, %s733_s24 }
  0x1e   :  { %p740_p0 = por %p739_p13, %p738_p12 }
  0x20   :  { %p741_p1 = pnand %p740_p0, %p734_p11 }
  0x22   :  { %744 = shalt.err (!%p741_p1)
}
  0x23   :  { %s823_s1 = smov 256   ;;  %s824_s25 = smov 16  }
  0x24   :  { %27 = dma.hbm_to_vmem [thread:$0]  %s956_s0, 512, %s22_s16, [#allocation3], %s823_s1, %s823_s1, %s824_s25  }
  0x25   :  { %s825_s28 = smov [#allocation7]   ;;  %s826_s30 = smov [#allocation8]  }
  0x26   :  { %s47_s29 = sshll.u32 %s825_s28, 4  ;;  %s61_s8 = sshll.u32 %s826_s30, 4  ;;  %s48_s29 = int_to_ptr.vmem [resolvable:$true] %s47_s29  ;;  %s895_s8 = int_to_ptr.vmem [resolvable:$true] %s61_s8 }
  0x27   :  { %s745_s13 = scalar_lea.hbm %s959_s3, 2048 }
  0x28   :  { %p746_p2 = scmp.ne.s32.totalorder %s959_s3, %s745_s13  ;;  %p749_p3 = scmp.lt.u32.totalorder %s745_s13, %s959_s3 }
  0x2a   :  { %p751_p4 = pnand %p749_p3, %p746_p2 }
  0x2c   :  { %754 = shalt.err (!%p751_p4)
}
  0x2d   :  { %s755_s0 = scalar_lea.vmem %s48_s29, 2048  ;;  %p760_p6 = scmp.lt.s32.totalorder %s48_s29, %s48_s29 }
  0x2e   :  { %p756_p5 = scmp.ne.s32.totalorder %s48_s29, %s755_s0  ;;  %p761_p7 = scmp.lt.s32.totalorder %s755_s0, %s755_s0 }
  0x30   :  { %p762_p8 = por %p761_p7, %p760_p6 }
  0x32   :  { %p763_p9 = pnand %p762_p8, %p756_p5 }
  0x34   :  { %766 = shalt.err (!%p763_p9)
}
  0x35   :  { %53 = dma.hbm_to_vmem [thread:$0]  %s959_s3, 2048, %s48_s29, [#allocation6], %s820_s11, %s820_s11, %s821_s12  }
  0x36   :  { %s767_s22 = scalar_lea.hbm %s961_s5, 2048 }
  0x37   :  { %p768_p10 = scmp.ne.s32.totalorder %s961_s5, %s767_s22  ;;  %p771_p11 = scmp.lt.u32.totalorder %s767_s22, %s961_s5 }
  0x39   :  { %p773_p12 = pnand %p771_p11, %p768_p10 }
  0x3b   :  { %776 = shalt.err (!%p773_p12)
}
  0x3c   :  { %s777_s26 = scalar_lea.vmem %s895_s8, 2048  ;;  %p782_p0 = scmp.lt.s32.totalorder %s895_s8, %s895_s8 }
  0x3d   :  { %p778_p13 = scmp.ne.s32.totalorder %s895_s8, %s777_s26  ;;  %p783_p1 = scmp.lt.s32.totalorder %s777_s26, %s777_s26 }
  0x3f   :  { %p784_p2 = por %p783_p1, %p782_p0 }
  0x41   :  { %p785_p3 = pnand %p784_p2, %p778_p13 }
  0x43   :  { %788 = shalt.err (!%p785_p3)
}
  0x44   :  { %67 = dma.hbm_to_vmem [thread:$0]  %s961_s5, 2048, %s895_s8, [#allocation9], %s820_s11, %s820_s11, %s821_s12  }
  0x45   :  { %811 = dma.done.wait [#allocation3], 512  }
  0x46   :  { %812 = vsyncadd [#allocation3], 4294966784 }
  0x47   :  { %813 = dma.done.wait [#allocation6], 6144  }
  0x48   :  { %814 = vsyncadd [#allocation6], 4294961152 }
  0x49   :  { %815 = dma.done.wait [#allocation9], 2048  }
  0x4a   :  { %816 = vsyncadd [#allocation9], 4294965248  ;;  %v102_v0 = vld [vmem:[#allocation5 + $0x80] sm:$0xff]  ;;  %v103_v1 = vld [vmem:[#allocation5 + $0x88] sm:$0xff] }
  0x4b   :  { %v86_v2 = vld [vmem:[#allocation5] sm:$0xff]  ;;  %v588_v3 = vpack.c.bf16 %v103_v1, %v102_v0  ;;  %v87_v4 = vld [vmem:[#allocation5 + $0x8] sm:$0xff]  ;;  %v104_v5 = vld [vmem:[#allocation5 + $0x90] sm:$0xff] }
  0x4c   :  { %v105_v6 = vld [vmem:[#allocation5 + $0x98] sm:$0xff]  ;;  %v590_v7 = vpack.c.bf16 %v87_v4, %v86_v2  ;;  %v88_v9 = vld [vmem:[#allocation5 + $0x10] sm:$0xff]  ;;  %v106_v11 = vld [vmem:[#allocation5 + $0xa0] sm:$0xff] }
  0x4d   :  { %v592_v8 = vpack.c.bf16 %v105_v6, %v104_v5  ;;  %v89_v10 = vld [vmem:[#allocation5 + $0x18] sm:$0xff]  ;;  %589 = vmatprep.subr.bf16.mxu0 %v588_v3  ;;  %v107_v12 = vld [vmem:[#allocation5 + $0xa8] sm:$0xff]  ;;  %v90_v15 = vld [vmem:[#allocation5 + $0x20] sm:$0xff] }
  0x4e   :  { %591 = vmatpush3.bf16.msra.mxu0 %v590_v7  ;;  %v594_v13 = vpack.c.bf16 %v89_v10, %v88_v9  ;;  %v596_v14 = vpack.c.bf16 %v107_v12, %v106_v11  ;;  %v91_v16 = vld [vmem:[#allocation5 + $0x28] sm:$0xff]  ;;  %v108_v17 = vld [vmem:[#allocation5 + $0xb0] sm:$0xff]  ;;  %v109_v18 = vld [vmem:[#allocation5 + $0xb8] sm:$0xff] }
  0x4f   :  { %593 = vmatprep.subr.bf16.mxu0 %v592_v8  ;;  %v598_v19 = vpack.c.bf16 %v91_v16, %v90_v15  ;;  %v600_v20 = vpack.c.bf16 %v109_v18, %v108_v17  ;;  %v92_v21 = vld [vmem:[#allocation5 + $0x30] sm:$0xff]  ;;  %v93_v22 = vld [vmem:[#allocation5 + $0x38] sm:$0xff]  ;;  %v110_v23 = vld [vmem:[#allocation5 + $0xc0] sm:$0xff] }
  0x50   :  { %v111_v24 = vld [vmem:[#allocation5 + $0xc8] sm:$0xff]  ;;  %v94_v26 = vld [vmem:[#allocation5 + $0x40] sm:$0xff]  ;;  %v602_v27 = vpack.c.bf16 %v93_v22, %v92_v21  ;;  %v204_v30 = vld [vmem:[#allocation7 + $0x10] sm:$0xff] }
  0x51   :  { %v83_v25 = vld [vmem:[#allocation2 + $0x8] sm:$0xff]  ;;  %v202_v28 = vld [vmem:[#allocation7] sm:$0xff]  ;;  %v604_v31 = vpack.c.bf16 %v111_v24, %v110_v23  ;;  %v112_v33 = vld [vmem:[#allocation5 + $0xd0] sm:$0xff] }
  0x52   :  { %595 = vmatpush3.bf16.msra.mxu0 %v594_v13  ;;  %189 = vmatprep.mubr.f32.mxu0 %v83_v25  ;;  %v203_v29 = vld [vmem:[#allocation7 + $0x8] sm:$0xff]  ;;  %v205_v35 = vld [vmem:[#allocation7 + $0x18] sm:$0xff]  ;;  %v206_v38 = vld [vmem:[#allocation7 + $0x20] sm:$0xff] }
  0x53   :  { %597 = vmatprep.subr.bf16.mxu0 %v596_v14  ;;  %v95_v32 = vld [vmem:[#allocation5 + $0x48] sm:$0xff]  ;;  %v620_v34 = vpack.c.bf16 %v203_v29, %v202_v28  ;;  %v113_v36 = vld [vmem:[#allocation5 + $0xd8] sm:$0xff]  ;;  %v624_v37 = vpack.c.bf16 %v205_v35, %v204_v30  ;;  %v96_v42 = vld [vmem:[#allocation5 + $0x50] sm:$0xff] }
  0x54   :  { %v207_v39 = vld [vmem:[#allocation7 + $0x28] sm:$0xff]  ;;  %v606_v40 = vpack.c.bf16 %v95_v32, %v94_v26  ;;  %v608_v41 = vpack.c.bf16 %v113_v36, %v112_v33  ;;  %v97_v43 = vld [vmem:[#allocation5 + $0x58] sm:$0xff]  ;;  %v114_v44 = vld [vmem:[#allocation5 + $0xe0] sm:$0xff] }
  0x55   :  { %621 = vmatprep.subr.bf16.mxu1 %v620_v34  ;;  %v628_v45 = vpack.c.bf16 %v207_v39, %v206_v38  ;;  %v115_v46 = vld [vmem:[#allocation5 + $0xe8] sm:$0xff]  ;;  %v208_v47 = vld [vmem:[#allocation7 + $0x30] sm:$0xff]  ;;  %v209_v48 = vld [vmem:[#allocation7 + $0x38] sm:$0xff]  ;;  %v610_v49 = vpack.c.bf16 %v97_v43, %v96_v42 }
  0x56   :  { %599 = vmatpush3.bf16.msra.mxu0 %v598_v19  ;;  %623 = vmatpush3.bf16.msra.mxu1 %v620_v34  ;;  %v612_v50 = vpack.c.bf16 %v115_v46, %v114_v44  ;;  %v98_v51 = vld [vmem:[#allocation5 + $0x60] sm:$0xff]  ;;  %v99_v52 = vld [vmem:[#allocation5 + $0x68] sm:$0xff]  ;;  %v116_v53 = vld [vmem:[#allocation5 + $0xf0] sm:$0xff]  ;;  %v632_v54 = vpack.c.bf16 %v209_v48, %v208_v47 }
  0x57   :  { %601 = vmatprep.subr.bf16.mxu0 %v600_v20  ;;  %625 = vmatprep.subr.bf16.mxu1 %v624_v37  ;;  %v117_v55 = vld [vmem:[#allocation5 + $0xf8] sm:$0xff]  ;;  %v210_v56 = vld [vmem:[#allocation7 + $0x40] sm:$0xff]  ;;  %v211_v57 = vld [vmem:[#allocation7 + $0x48] sm:$0xff]  ;;  %v614_v58 = vpack.c.bf16 %v99_v52, %v98_v51 }
  0x58   :  { %v616_v59 = vpack.c.bf16 %v117_v55, %v116_v53  ;;  %v100_v60 = vld [vmem:[#allocation5 + $0x70] sm:$0xff]  ;;  %v101_v61 = vld [vmem:[#allocation5 + $0x78] sm:$0xff]  ;;  %v636_v62 = vpack.c.bf16 %v211_v57, %v210_v56  ;;  %v82_v0 = vld [vmem:[#allocation2] sm:$0xff] }
  0x59   :  { %v618_v63 = vpack.c.bf16 %v101_v61, %v100_v60  ;;  %v85_v1 = vld [vmem:[#allocation2 + $0x18] sm:$0xff]  ;;  %v84_v2 = vld [vmem:[#allocation2 + $0x10] sm:$0xff]  ;;  %v214_v6 = vld [vmem:[#allocation7 + $0x60] sm:$0xff] }
  0x5a   :  { %603 = vmatpush3.bf16.msra.mxu0 %v602_v27  ;;  %627 = vmatpush3.bf16.msra.mxu1 %v624_v37  ;;  %v212_v3 = vld [vmem:[#allocation7 + $0x50] sm:$0xff]  ;;  %v213_v4 = vld [vmem:[#allocation7 + $0x58] sm:$0xff]  ;;  %v215_v7 = vld [vmem:[#allocation7 + $0x68] sm:$0xff] }
  0x5b   :  { %605 = vmatprep.subr.bf16.mxu0 %v604_v31  ;;  %629 = vmatprep.subr.bf16.mxu1 %v628_v45  ;;  %v640_v5 = vpack.c.bf16 %v213_v4, %v212_v3  ;;  %v644_v8 = vpack.c.bf16 %v215_v7, %v214_v6  ;;  %v216_v9 = vld [vmem:[#allocation7 + $0x70] sm:$0xff]  ;;  %v217_v10 = vld [vmem:[#allocation7 + $0x78] sm:$0xff]  ;;  %v302_v12 = vld [vmem:[#allocation8] sm:$0xff] }
  0x5c   :  { %v648_v11 = vpack.c.bf16 %v217_v10, %v216_v9  ;;  %v303_v13 = vld [vmem:[#allocation8 + $0x8] sm:$0xff]  ;;  %v304_v14 = vld [vmem:[#allocation8 + $0x10] sm:$0xff]  ;;  %v305_v16 = vld [vmem:[#allocation8 + $0x18] sm:$0xff] }
  0x5d   :  { %v652_v15 = vpack.c.bf16 %v303_v13, %v302_v12  ;;  %v656_v17 = vpack.c.bf16 %v305_v16, %v304_v14  ;;  %v306_v18 = vld [vmem:[#allocation8 + $0x20] sm:$0xff]  ;;  %v307_v19 = vld [vmem:[#allocation8 + $0x28] sm:$0xff]  ;;  %v308_v21 = vld [vmem:[#allocation8 + $0x30] sm:$0xff] }
  0x5e   :  { %607 = vmatpush3.bf16.msra.mxu0 %v606_v40  ;;  %631 = vmatpush3.bf16.msra.mxu1 %v628_v45  ;;  %v660_v20 = vpack.c.bf16 %v307_v19, %v306_v18  ;;  %v309_v22 = vld [vmem:[#allocation8 + $0x38] sm:$0xff]  ;;  %v310_v24 = vld [vmem:[#allocation8 + $0x40] sm:$0xff]  ;;  %v311_v25 = vld [vmem:[#allocation8 + $0x48] sm:$0xff] }
  0x5f   :  { %609 = vmatprep.subr.bf16.mxu0 %v608_v41  ;;  %633 = vmatprep.subr.bf16.mxu1 %v632_v54  ;;  %v664_v23 = vpack.c.bf16 %v309_v22, %v308_v21  ;;  %v668_v26 = vpack.c.bf16 %v311_v25, %v310_v24  ;;  %v312_v27 = vld [vmem:[#allocation8 + $0x50] sm:$0xff]  ;;  %v313_v28 = vld [vmem:[#allocation8 + $0x58] sm:$0xff]  ;;  %v314_v30 = vld [vmem:[#allocation8 + $0x60] sm:$0xff] }
  0x60   :  { %v672_v29 = vpack.c.bf16 %v313_v28, %v312_v27  ;;  %v315_v31 = vld [vmem:[#allocation8 + $0x68] sm:$0xff]  ;;  %v441_v35 = vld [vmem:[%s958_s2] ss:$0 sm:$0xff]  ;;  %v316_v44 = vld [vmem:[#allocation8 + $0x70] sm:$0xff] }
  0x61   :  { %v676_v32 = vpack.c.bf16 %v315_v31, %v314_v30  ;;  %v317_v45 = vld [vmem:[#allocation8 + $0x78] sm:$0xff]  ;;  %v442_v47 = vld [vmem:[%s960_s4] ss:$0 sm:$0xff]  ;;  %s827_s4 = smov [#allocation10]  }
  0x62   :  { %611 = vmatpush3.bf16.msra.mxu0 %v610_v49  ;;  %635 = vmatpush3.bf16.msra.mxu1 %v632_v54  ;;  %v680_v46 = vpack.c.bf16 %v317_v45, %v316_v44  ;;  %v443_v54 = vld [vmem:[%s962_s6] ss:$0 sm:$0xff]  ;;  %s427_s6 = sshll.u32 %s827_s4, 4  ;;  %s428_s6 = int_to_ptr.vmem [resolvable:$true] %s427_s6 }
  0x63   :  { %613 = vmatprep.subr.bf16.mxu0 %v612_v50  ;;  %637 = vmatprep.subr.bf16.mxu1 %v636_v62  ;;  %s789_s9 = scalar_lea.vmem %s428_s6, 256  ;;  %p794_p5 = scmp.lt.s32.totalorder %s428_s6, %s428_s6 }
  0x64   :  { %p790_p4 = scmp.ne.s32.totalorder %s428_s6, %s789_s9  ;;  %p795_p6 = scmp.lt.s32.totalorder %s789_s9, %s789_s9 }
  0x66   :  { %615 = vmatpush3.bf16.msra.mxu0 %v614_v58  ;;  %639 = vmatpush3.bf16.msra.mxu1 %v636_v62  ;;  %p796_p7 = por %p795_p6, %p794_p5 }
  0x67   :  { %617 = vmatprep.subr.bf16.mxu0 %v616_v59  ;;  %641 = vmatprep.subr.bf16.mxu1 %v640_v5 }
  0x68   :  { %p797_p8 = pnand %p796_p7, %p790_p4 }
  0x6a   :  { %619 = vmatpush3.bf16.msra.mxu0 %v618_v63  ;;  %643 = vmatpush3.bf16.msra.mxu1 %v640_v5 }
  0x6b   :  { %645 = vmatprep.subr.bf16.mxu1 %v644_v8  ;;  %653 = vmatprep.subr.bf16.mxu0 %v652_v15 }
  0x6d   :  { %190 = vmatmul.mubr.f32.vlgmr.msra.gmra.mrb[0].mxu0 %v82_v0 }
  0x6e   :  { %194 = vmatprep.mubr.f32.mxu0 %v85_v1  ;;  %647 = vmatpush3.bf16.msra.mxu1 %v644_v8 }
  0x6f   :  { %649 = vmatprep.subr.bf16.mxu1 %v648_v11  ;;  %655 = vmatpush3.bf16.msra.mxu0 %v652_v15 }
  0x70   :  { %657 = vmatprep.subr.bf16.mxu0 %v656_v17 }
  0x71   :  { %195 = vmatmul.mubr.f32.gmra.mrb[2].mxu0 %v84_v2 }
  0x72   :  { %651 = vmatpush3.bf16.msra.mxu1 %v648_v11 }
  0x73   :  { %659 = vmatpush3.bf16.msra.mxu0 %v656_v17 }
  0x74   :  { %661 = vmatprep.subr.bf16.mxu0 %v660_v20 }
  0x77   :  { %663 = vmatpush3.bf16.msra.mxu0 %v660_v20 }
  0x78   :  { %665 = vmatprep.subr.bf16.mxu0 %v664_v23 }
  0x7b   :  { %667 = vmatpush3.bf16.msra.mxu0 %v664_v23 }
  0x7c   :  { %669 = vmatprep.subr.bf16.mxu0 %v668_v26 }
  0x7f   :  { %671 = vmatpush3.bf16.msra.mxu0 %v668_v26 }
  0x80   :  { %673 = vmatprep.subr.bf16.mxu0 %v672_v29 }
  0x83   :  { %675 = vmatpush3.bf16.msra.mxu0 %v672_v29 }
  0x84   :  { %677 = vmatprep.subr.bf16.mxu0 %v676_v32 }
  0x87   :  { %679 = vmatpush3.bf16.msra.mxu0 %v676_v32 }
  0x88   :  { %681 = vmatprep.subr.bf16.mxu0 %v680_v46 }
  0x8b   :  { %683 = vmatpush3.bf16.msra.mxu0 %v680_v46 }
 0x140   :  { %v476_v33 = vpop.f32.mrb[0].mxu0 }
 0x141   :  { %v477_v34 = vpop.f32.mrb[1].mxu0 }
 0x142   :  { %v478_v36 = vadd.f32 %v477_v34, %v476_v33 }
 0x144   :  { %v479_v37 = vpop.f32.mrb[2].mxu0  ;;  %v192_v38 = vadd.f32 %v478_v36, %v441_v35 }
 0x145   :  { %v480_v39 = vpop.f32.mrb[3].mxu0 }
 0x146   :  { %v481_v40 = vadd.f32 %v480_v39, %v479_v37  ;;  %v200_v41 = vmax.f32 %v192_v38, 0.0 }
 0x148   :  { %v197_v42 = vadd.f32 %v481_v40, %v441_v35  ;;  %550 = vmatprep.mubr.f32.mxu1 %v200_v41 }
 0x14a   :  { %v201_v43 = vmax.f32 %v197_v42, 0.0 }
 0x14c   :  { %551 = vmatmul.mubr.f32.vlgmr.msra.gmra.mrb[0].mxu1 %v201_v43 }
 0x21f   :  { %v552_v48 = vpop.f32.mrb[0].mxu1 }
 0x220   :  { %v297_v49 = vadd.f32 %v552_v48, %v442_v47  ;;  %v291_v50 = vpop.f32.mrb[1].mxu1 }
 0x221   :  { %v292_v51 = vadd.f32 %v442_v47, %v291_v50 }
 0x222   :  { %v301_v53 = vmax.f32 %v297_v49, 0.0 }
 0x223   :  { %v300_v52 = vmax.f32 %v292_v51, 0.0 }
 0x225   :  { %585 = vmatprep.mubr.f32.mxu0 %v300_v52 }
 0x226   :  { %586 = vmatmul.mubr.f32.vlgmr.msra.gmra.mrb[4].mxu0 %v301_v53 }
 0x2f9   :  { %v587_v55 = vpop.f32.mrb[4].mxu0 }
 0x2fa   :  { %v391_v56 = vpop.f32.mrb[5].mxu0  ;;  %v397_v58 = vadd.f32 %v587_v55, %v443_v54 }
 0x2fb   :  { %v392_v57 = vadd.f32 %v443_v54, %v391_v56 }
 0x2fd   :  { %400 = vmax.xlane.f32.xlu0 %v392_v57 }
 0x301   :  { %402 = vmax.xlane.f32.xlu0 %v397_v58 }
 0x38a   :  { %v401_v59 = vpop.xlane.xlu0 %400 }
 0x38b   :  { %v404_v60 = vsub.f32 %v392_v57, %v401_v59 }
 0x38d   :  { %v406_v61 = vmul.f32 1.442695, %v404_v60 }
 0x38e   :  { %v403_v62 = vpop.xlane.xlu0 %402 }
 0x38f   :  { %v405_v63 = vsub.f32 %v397_v58, %v403_v62  ;;  %693 = vpow2.f32 %v406_v61 }
 0x391   :  { %v408_v0 = vmul.f32 1.442695, %v405_v63 }
 0x393   :  { %695 = vpow2.f32 %v408_v0 }
 0x399   :  { %v694_v1 = vpop.eup %693 }
 0x39a   :  { %410 = vadd.xlane.f32.xlu1 %v694_v1 }
 0x39d   :  { %v696_v2 = vpop.eup %695 }
 0x39e   :  { %412 = vadd.xlane.f32.xlu1 %v696_v2 }
 0x427   :  { %v411_v3 = vpop.xlane.xlu1 %410 }
 0x428   :  { %697 = vlog2.f32 %v411_v3 }
 0x42b   :  { %v413_v4 = vpop.xlane.xlu1 %412 }
 0x42c   :  { %699 = vlog2.f32 %v413_v4 }
 0x432   :  { %v698_v5 = vpop.eup %697 }
 0x433   :  { %v415_v6 = vmul.f32 0.6931472, %v698_v5 }
 0x435   :  { %v418_v7 = vsub.f32 %v404_v60, %v415_v6 }
 0x436   :  { %v700_v8 = vpop.eup %699 }
 0x437   :  { %420 = vst [vmem:[#allocation10] sm:$0xff] %v418_v7  ;;  %v417_v9 = vmul.f32 0.6931472, %v700_v8 }
 0x439   :  { %v419_v10 = vsub.f32 %v405_v63, %v417_v9 }
 0x43b   :  { %421 = vst [vmem:[#allocation10 + $0x8] sm:$0xff] %v419_v10 }
 0x43c   :  { %800 = shalt.err (!%p797_p8)
}
 0x43d   :  { %s801_s14 = scalar_lea.hbm %s963_s7, 256 }
 0x43e   :  { %p802_p9 = scmp.ne.s32.totalorder %s963_s7, %s801_s14  ;;  %p805_p10 = scmp.lt.u32.totalorder %s801_s14, %s963_s7 }
 0x440   :  { %p807_p11 = pnand %p805_p10, %p802_p9 }
 0x442   :  { %810 = shalt.err (!%p807_p11)
}
 0x443   :  { %433 = dma.vmem_to_hbm [thread:$0]  %s428_s6, 256, %s963_s7, [#allocation4], %s820_s11, %s820_s11, %s821_s12  }
 0x444   :  { %817 = dma.done.wait [#allocation4], 256  }
 0x445   :  { %818 = vsyncadd [#allocation4], 4294967040 }
 0x446   :  { %437 = vsyncpa [#allocation3], 1 }
 0x447   :  { %438 = vsyncpa [#allocation6], 1 }
 0x448   :  { %439 = vsyncpa [#allocation9], 1 }
 0x449   :  { %440 = vsyncpa [#allocation4], 1 }

</bundles_post_ra>
